<compile_context>
chip_gen: v7x
topology: tpu7x:2x2x1
jax: 0.10.0
libtpu: 0.0.40
codegen_flags: <defaults>
</compile_context>

<pallas_src>
import functools

import jax
import jax.numpy as jnp
from jax.experimental import pallas as pl
from jax.experimental.pallas import tpu as pltpu


def _round_up(x, m):
    return ((x + m - 1) // m) * m


# --------------------------------------------------------------------------
# Pallas kernel: one (tm, K) row-tile of x against the resident (K, Np) weight
# --------------------------------------------------------------------------
def _linear_kernel(x_ref, w_ref, b_ref, o_ref):
    # x_ref: (tm, K) bf16   w_ref: (K, Np) bf16   b_ref: (1, Np) f32
    # o_ref: (tm, Np) f32
    acc = jnp.dot(x_ref[...], w_ref[...], preferred_element_type=jnp.float32)
    o_ref[...] = (acc + b_ref[...]).astype(o_ref.dtype)


def _pallas_linear(x2d, weight, bias, *, block_rows=512):
    """x2d: (M, K) bf16, weight: (K, Np) bf16, bias: (1, Np) f32 -> (M, Np) f32.

    M must be a multiple of 8 and Np a multiple of 128 (the wrapper pads).
    """
    M, K = x2d.shape
    Kw, Np = weight.shape
    assert Kw == K

    # Row tile: biggest of (block_rows, full M).  Both are valid block shapes:
    # either tm == M (full dim) or tm is a multiple of 8.
    tm = min(block_rows, M)
    grid = (pl.cdiv(M, tm),)

    return pl.pallas_call(
        _linear_kernel,
        out_shape=jax.ShapeDtypeStruct((M, Np), jnp.float32),
        grid_spec=pltpu.PrefetchScalarGridSpec(
            num_scalar_prefetch=0,
            grid=grid,
            in_specs=[
                # x: one row tile per grid step (auto double-buffered DMA)
                pl.BlockSpec((tm, K), lambda i: (i, 0)),
                # weight / bias: constant index_map -> stay resident in VMEM
                pl.BlockSpec((K, Np), lambda i: (0, 0)),
                pl.BlockSpec((1, Np), lambda i: (0, 0)),
            ],
            out_specs=pl.BlockSpec((tm, Np), lambda i: (i, 0)),
        ),
        compiler_params=pltpu.CompilerParams(
            # Row tiles are independent -> shard across TCs on v7x megacore.
            dimension_semantics=("parallel",),
        ),
    )(x2d, weight, bias)


# --------------------------------------------------------------------------
# Forward wrapper (layout plumbing around the kernel)
# --------------------------------------------------------------------------
def _apply_linear(x, weight, bias, use_pallas=True):
    """x: (B, T, 1, K) f32, weight: (K, N) f32, bias: (1, N) f32 -> (B, T, N) f32."""
    B, T, one, K = x.shape
    assert one == 1
    N = weight.shape[1]
    M = B * T

    if not use_pallas:
        # Tiny-problem fallback: let XLA fuse matmul + bias (Pallas launch
        # overhead exceeds the work below a few hundred rows).
        return (jnp.matmul(x, weight) + bias).reshape(B, T, N)

    x2d = x.reshape(M, K)

    # Pad rows to a multiple of 8 (sublane) and out_features to a multiple of
    # 128 (lane-dense output -> unmasked full-lane stores).
    M_pad = _round_up(max(M, 8), 8)
    N_pad = _round_up(N, 128)
    if M_pad != M:
        x2d = jnp.pad(x2d, ((0, M_pad - M), (0, 0)))
    w_p = weight if N_pad == N else jnp.pad(weight, ((0, 0), (0, N_pad - N)))
    b_p = bias if N_pad == N else jnp.pad(bias, ((0, 0), (0, N_pad - N)))

    # bf16 streaming operands (halves HBM traffic for x), f32 accumulate/bias.
    y = _pallas_linear(
        x2d.astype(jnp.bfloat16),
        w_p.astype(jnp.bfloat16),
        b_p.astype(jnp.float32),
    )
    y = y[:M, :N]
    # reshape back == matmul result (B, T, 1, N) then squeeze(2)
    return y.reshape(B, T, N)


@jax.jit
def _forward_det(x, weight_mu, bias_mu):
    return _apply_linear(x, weight_mu, bias_mu, use_pallas=True)


@jax.jit
def _forward_sampled(x, weight_mu, weight_rho, bias_mu, bias_rho, key):
    kw, kb = jax.random.split(key)
    w_sigma = jnp.log1p(jnp.exp(weight_rho))          # softplus
    b_sigma = jnp.log1p(jnp.exp(bias_rho))
    weight = weight_mu + w_sigma * jax.random.normal(kw, weight_mu.shape, jnp.float32)
    bias = bias_mu + b_sigma * jax.random.normal(kb, bias_mu.shape, jnp.float32)
    return _apply_linear(x, weight, bias, use_pallas=True)


# --------------------------------------------------------------------------
# Module: parameters + forward
# --------------------------------------------------------------------------
class BayesLSTMLinear:
    def __init__(self, in_features, out_features, key):
        self.in_features = in_features
        self.out_features = out_features
        k0, k1, k2, k3 = jax.random.split(key, 4)
        # Same init distributions as the PyTorch module.
        self.weight_mu = jax.random.uniform(
            k0, (in_features, out_features), jnp.float32, -0.2, 0.2)
        self.bias_mu = jax.random.uniform(
            k1, (1, out_features), jnp.float32, -0.2, 0.2)
        self.weight_rho = jax.random.uniform(
            k2, (in_features, out_features), jnp.float32, -5.0, -4.0)
        self.bias_rho = jax.random.uniform(
            k3, (1, out_features), jnp.float32, -5.0, -4.0)

    def forward(self, x, sampling=False, sample_key=None):
        # x: (B, T, 1, in_features)
        # TODO(synk): log_prior / log_variational_posterior (ScaledMixedGaussian
        # log-probs) are training-only side effects and are not computed here.
        if sampling:
            return _forward_sampled(x, self.weight_mu, self.weight_rho,
                                    self.bias_mu, self.bias_rho, sample_key)
        return _forward_det(x, self.weight_mu, self.bias_mu)


# --------------------------------------------------------------------------
if __name__ == "__main__":
    key = jax.random.PRNGKey(0)
    pkey, xkey = jax.random.split(key)

    in_features = 32
    out_features = 32
    batch, seq = 2, 8

    module = BayesLSTMLinear(in_features, out_features, pkey)
    x = jax.random.normal(xkey, (batch, seq, 1, in_features), jnp.float32)

    y = module.forward(x)  # deterministic (mu) path, like eval mode
    y = jax.block_until_ready(y)

    # Reference check (kernel uses bf16 operands + f32 accumulation, so the
    # reference applies the same rounding of the inputs).
    x_r = x.astype(jnp.bfloat16).astype(jnp.float32)
    w_r = module.weight_mu.astype(jnp.bfloat16).astype(jnp.float32)
    y_ref = (jnp.matmul(x_r, w_r) + module.bias_mu).squeeze(2)

    assert y.shape == (batch, seq, out_features)
    assert jnp.allclose(y, y_ref, atol=1e-3, rtol=1e-3)

    print("KERNEL_OK")
</pallas_src>

<mosaic_0001>
module attributes {stable_mosaic.version = 11 : i64} {
  func.func @_linear_kernel(%arg0: i32, %arg1: memref<16x32xbf16, #tpu.memory_space<vmem>>, %arg2: memref<32x128xbf16, #tpu.memory_space<vmem>>, %arg3: memref<1x128xf32, #tpu.memory_space<vmem>>, %arg4: memref<16x128xf32, #tpu.memory_space<vmem>>) attributes {dimension_semantics = [#tpu.dimension_semantics<parallel>], iteration_bounds = array<i64: 1>, scalar_prefetch = 0 : i64, scratch_operands = 0 : i64, tpu.core_type = #tpu.core_type<tc>, window_params = [{transform_indices = @transform_0, window_bounds = array<i64: 16, 32>}, {pipeline_mode = #tpu.pipeline_mode<synchronous>, transform_indices = @transform_1, window_bounds = array<i64: 32, 128>}, {pipeline_mode = #tpu.pipeline_mode<synchronous>, transform_indices = @transform_2, window_bounds = array<i64: 1, 128>}, {transform_indices = @transform_3, window_bounds = array<i64: 16, 128>}]} {
    %c0 = arith.constant 0 : index
    %c0_0 = arith.constant 0 : index
    %0 = vector.load %arg1[%c0, %c0_0] : memref<16x32xbf16, #tpu.memory_space<vmem>>, vector<16x32xbf16>
    %c0_1 = arith.constant 0 : index
    %c0_2 = arith.constant 0 : index
    %1 = vector.load %arg2[%c0_1, %c0_2] : memref<32x128xbf16, #tpu.memory_space<vmem>>, vector<32x128xbf16>
    %cst = arith.constant dense<0.000000e+00> : vector<16x128xf32>
    %2 = tpu.matmul %0, %1, %cst {dimension_numbers = #tpu.dot_dimension_numbers<[1], [0], [0], [1], [0, 0, 1, 1], [], []>} : vector<16x32xbf16>, vector<32x128xbf16>, vector<16x128xf32> -> vector<16x128xf32>
    %c0_3 = arith.constant 0 : index
    %c0_4 = arith.constant 0 : index
    %3 = vector.load %arg3[%c0_3, %c0_4] : memref<1x128xf32, #tpu.memory_space<vmem>>, vector<1x128xf32>
    %4 = vector.broadcast %3 : vector<1x128xf32> to vector<16x128xf32>
    %5 = arith.addf %2, %4 : vector<16x128xf32>
    %c0_5 = arith.constant 0 : index
    %c0_6 = arith.constant 0 : index
    %6 = vector.load %arg4[%c0_5, %c0_6] : memref<16x128xf32, #tpu.memory_space<vmem>>, vector<16x128xf32>
    tpu.vector_store %arg4[%c0_5, %c0_6], %5 {strides = array<i32>} : memref<16x128xf32, #tpu.memory_space<vmem>>, vector<16x128xf32>,
    return
  }
  func.func @transform_0(%arg0: i32) -> (i32, i32) {
    %c0_i32 = arith.constant 0 : i32
    %c0_i32_0 = arith.constant 0 : i32
    return %arg0, %c0_i32 : i32, i32
  }
  func.func @transform_1(%arg0: i32) -> (i32, i32) {
    %c0_i32 = arith.constant 0 : i32
    %c0_i32_0 = arith.constant 0 : i32
    %c0_i32_1 = arith.constant 0 : i32
    return %c0_i32, %c0_i32_0 : i32, i32
  }
  func.func @transform_2(%arg0: i32) -> (i32, i32) {
    %c0_i32 = arith.constant 0 : i32
    %c0_i32_0 = arith.constant 0 : i32
    %c0_i32_1 = arith.constant 0 : i32
    return %c0_i32, %c0_i32_0 : i32, i32
  }
  func.func @transform_3(%arg0: i32) -> (i32, i32) {
    %c0_i32 = arith.constant 0 : i32
    %c0_i32_0 = arith.constant 0 : i32
    return %arg0, %c0_i32 : i32, i32
  }
}

</mosaic_0001>

<bundles_post_ra>
// kernel: _forward_det.1
= control target key start
LH: loop header
LB: loop body
LE: loop exit
PB: predicated region body
PF: predicated region fallthrough
CT: control target
= control target key end

     0   :  { %v117_v0 = vmov 0.0   ;;  %vm118_vm0 = vmmov 0   ;;  %vm45_vm1 = vcmask 261120   ;;  %s157_s1 = inlined_call_operand.vmem [shape: bf16[32,128], index: 1, kind: input, shape index: {}]   ;;  %s158_s0 = inlined_call_operand.vmem [shape: bf16[16,32], index: 0, kind: input, shape index: {}]   ;;  %s159_s2 = inlined_call_operand.vmem [shape: f32[1,128], index: 2, kind: input, shape index: {}]   ;;  %s160_s3 = inlined_call_operand.vmem [shape: f32[16,128], index: 3, kind: output, shape index: {}]  }
   0x1   :  { %104 = vmatprep.subr.bf16.mxu0 %v117_v0  ;;  %v114_v1 = vld [vmem:[%s157_s1] sm:$0xff]   ;;  %108 = vmatprep.mubr.msk.bf16.mxu0 %vm118_vm0, %v117_v0  ;;  %v115_v2 = vld [vmem:[%s157_s1 + $0x8] sm:$0xff]  }
   0x2   :  { %105 = vmatpush3.bf16.msra.mxu0 %v114_v1  ;;  %v116_v3 = vld [vmem:[%s158_s0] sm:$0xff]  }
   0x3   :  { %106 = vmatprep.subr.bf16.mxu0 %v117_v0  ;;  %v96_v4 = vld [vmem:[%s159_s2] ss:$0 sm:$0xff] }
   0x6   :  { %107 = vmatpush3.bf16.msra.mxu0 %v115_v2 }
   0x9   :  { %109 = vmatmul.mubr.msk.bf16.vlgmr.msra.gmra.mrb[0].mxu0 %vm45_vm1, %v116_v3 }
  0xdc   :  { %v83_v5 = vpop.f32.mrb[0].mxu0 }
  0xdd   :  { %v84_v6 = vadd.f32 %v96_v4, %v83_v5  ;;  %v110_v7 = vpop.f32.mrb[1].mxu0 }
  0xde   :  { %v86_v8 = vpop.f32.mrb[2].mxu0 }
  0xdf   :  { %90 = vst [vmem:[%s160_s3] sm:$0xff] %v84_v6  ;;  %v87_v9 = vadd.f32 %v96_v4, %v86_v8  ;;  %v111_v10 = vpop.f32.mrb[3].mxu0 }
  0xe1   :  { %91 = vst [vmem:[%s160_s3 + $0x8] sm:$0xff] %v87_v9 }

</bundles_post_ra>
